<compile_context>
chip_gen: v7x
topology: tpu7x:2x2x1
jax: 0.10.0
libtpu: 0.0.40
codegen_flags: <defaults>
</compile_context>

<pallas_src>
import jax
import jax.numpy as jnp
from jax.experimental import pallas as pl
from jax.experimental.pallas import tpu as pltpu

EPS = 1e-5


def _gbn_kernel(x_ref, gamma_ref, beta_ref, o_ref):
    # x_ref block: (G, vb, TILE_D) -- G virtual batches, each normalized with
    # its own statistics taken over axis=1 (the virtual-batch axis).
    x = x_ref[...].astype(jnp.float32)
    mean = jnp.mean(x, axis=1, keepdims=True)                   # (G, 1, TILE_D)
    var = jnp.mean((x - mean) ** 2, axis=1, keepdims=True)      # biased (BN training)
    inv = jax.lax.rsqrt(var + EPS)
    # Fused affine: y = x * scale + shift
    scale = gamma_ref[...].astype(jnp.float32) * inv            # (1,1,T)*(G,1,T)
    shift = beta_ref[...].astype(jnp.float32) - mean * scale
    o_ref[...] = (x * scale + shift).astype(o_ref.dtype)


def _tuning(itemsize):
    """Generation-aware slab target / VMEM limit / multi-TC flag."""
    try:
        info = pltpu.get_tpu_info()
        vmem_cap = getattr(info, "vmem_capacity_bytes", None)
    except Exception:
        vmem_cap = None
    if vmem_cap is not None and vmem_cap <= 80 * 1024 * 1024:
        # v7x-class: 64 MiB VMEM per TC, ~3.2 TB/s HBM per TC, 2 TCs/chip.
        # Bigger slabs amortize the ~0.35us/step overhead at higher bandwidth.
        target, vmem_limit, multi_tc = 8 << 20, 56 << 20, True
    else:
        # v5e / v6e (128 MiB VMEM, single TC) or unknown: conservative default.
        target, vmem_limit, multi_tc = 4 << 20, 48 << 20, False
    # VMEM budget incl. Mosaic temporaries: 2x in + 2x out pipelined buffers
    # (input dtype) plus ~3 f32-sized elementwise temps per slab, plus margin.
    f32_per_in = 4.0 / float(itemsize)
    max_slab = int((vmem_limit - (8 << 20)) / (4.0 + 3.0 * f32_per_in))
    return min(target, max(max_slab, 1 << 20)), vmem_limit, multi_tc


def _gbn_chunked(x3, gamma3, beta3, slab_target, vmem_limit, multi_tc):
    """Normalize x3 of shape (num_chunks, vb, D), per-chunk statistics."""
    num_chunks, vb, D = x3.shape
    itemsize = x3.dtype.itemsize
    chunk_bytes = vb * D * itemsize

    if chunk_bytes <= slab_target:
        # Whole chunks fit: full feature extent, aggregate G chunks per step.
        tile_d = D
        G = int(max(1, min(num_chunks, slab_target // max(chunk_bytes, 1))))
    else:
        # A single chunk exceeds the slab target: tile the feature axis
        # (mean/var are per-feature, so this is exact).
        G = 1
        bytes_per_128 = 128 * vb * itemsize
        tile_d = int(max(1, slab_target // max(bytes_per_128, 1))) * 128
        tile_d = max(tile_d, 128)
        if tile_d >= D:
            # TODO(synk): huge vb with tiny D would need a two-pass streaming
            #             reduction; single oversized block used instead.
            tile_d = D

    grid_c = pl.cdiv(num_chunks, G)
    grid_d = pl.cdiv(D, tile_d)
    if multi_tc and grid_c * grid_d < 2 and num_chunks >= 2:
        # v7x only: keep >= 2 grid steps so both TensorCores get work.
        G = int(pl.cdiv(num_chunks, 2))
        grid_c = pl.cdiv(num_chunks, G)

    return pl.pallas_call(
        _gbn_kernel,
        out_shape=jax.ShapeDtypeStruct((num_chunks, vb, D), x3.dtype),
        grid_spec=pltpu.PrefetchScalarGridSpec(
            num_scalar_prefetch=0,
            grid=(grid_c, grid_d),
            in_specs=[
                pl.BlockSpec((G, vb, tile_d), lambda i, j: (i, 0, j)),   # x slab
                pl.BlockSpec((1, 1, tile_d), lambda i, j: (0, 0, j)),    # gamma
                pl.BlockSpec((1, 1, tile_d), lambda i, j: (0, 0, j)),    # beta
            ],
            out_specs=pl.BlockSpec((G, vb, tile_d), lambda i, j: (i, 0, j)),
        ),
        compiler_params=pltpu.CompilerParams(
            dimension_semantics=("parallel", "parallel"),
            vmem_limit_bytes=vmem_limit,
        ),
    )(x3, gamma3, beta3)


def ghost_batch_norm(x, gamma, beta, virtual_batch_size=64, training=True):
    """Pallas GhostBatchNorm forward.

    x: (B, D); gamma, beta: (D,)
    """
    B, D = x.shape
    gamma3 = gamma.reshape(1, 1, D).astype(jnp.float32)
    beta3 = beta.reshape(1, 1, D).astype(jnp.float32)
    slab_target, vmem_limit, multi_tc = _tuning(x.dtype.itemsize)

    if (not training) or (B <= virtual_batch_size):
        # Full-batch BN with batch (training) statistics.
        # TODO(synk): eval mode should use running_mean/running_var; they are a
        #             training side-effect not carried by this wrapper.
        out3 = _gbn_chunked(x.reshape(1, B, D), gamma3, beta3,
                            slab_target, vmem_limit, multi_tc)
        return out3.reshape(B, D)

    # Mirror torch.chunk(B // virtual_batch_size): chunk size = ceil(B / n),
    # a possibly-smaller ragged tail chunk gets its own statistics.
    n = B // virtual_batch_size
    chunk = -(-B // n)
    n_full = B // chunk
    rem = B - n_full * chunk

    if rem == 0:
        x_full = x.reshape(n_full, chunk, D)
    else:
        x_full = x[: n_full * chunk].reshape(n_full, chunk, D)

    out = _gbn_chunked(x_full, gamma3, beta3, slab_target, vmem_limit, multi_tc)
    out = out.reshape(n_full * chunk, D)

    if rem > 0:
        # TODO(synk): ragged tail chunk runs as a second pallas_call plus a
        #             concatenate (one extra HBM pass over the tail only).
        tail = _gbn_chunked(x[n_full * chunk:].reshape(1, rem, D), gamma3, beta3,
                            slab_target, vmem_limit, multi_tc)
        out = jnp.concatenate([out, tail.reshape(rem, D)], axis=0)
    return out


def ghost_batch_norm_ref(x, gamma, beta, virtual_batch_size=64, training=True):
    """Pure-JAX reference mirroring the PyTorch training-mode forward."""
    B, D = x.shape
    if (not training) or B <= virtual_batch_size:
        bounds = [(0, B)]
    else:
        n = B // virtual_batch_size
        size = -(-B // n)
        bounds = [(s, min(s + size, B)) for s in range(0, B, size)]
    outs = []
    for s, e in bounds:
        c = x[s:e].astype(jnp.float32)
        m = jnp.mean(c, axis=0, keepdims=True)
        v = jnp.mean((c - m) ** 2, axis=0, keepdims=True)
        y = (c - m) * jax.lax.rsqrt(v + EPS) * gamma[None, :] + beta[None, :]
        outs.append(y.astype(x.dtype))
    return jnp.concatenate(outs, axis=0)


if __name__ == "__main__":
    key = jax.random.PRNGKey(0)
    kx, kg, kb = jax.random.split(key, 3)

    B, D = 32, 32              # small shapes; D intentionally not a 128 multiple
    VB = 8                     # 4 virtual batches of 8

    x = jax.random.normal(kx, (B, D), dtype=jnp.float32) * 2.0 + 0.5
    gamma = 1.0 + 0.1 * jax.random.normal(kg, (D,), dtype=jnp.float32)
    beta = 0.1 * jax.random.normal(kb, (D,), dtype=jnp.float32)

    # Multi-chunk training path (no host-side pad/slice of x any more).
    out = ghost_batch_norm(x, gamma, beta, virtual_batch_size=VB, training=True)
    out = jax.block_until_ready(out)
    ref = ghost_batch_norm_ref(x, gamma, beta, virtual_batch_size=VB)
    assert out.shape == (B, D)
    assert jnp.max(jnp.abs(out - ref)) < 1e-4, "mismatch vs reference (chunked)"

    # Fallback (B <= virtual_batch_size) full-batch path.
    out_fb = ghost_batch_norm(x, gamma, beta, virtual_batch_size=64, training=True)
    out_fb = jax.block_until_ready(out_fb)
    ref_fb = ghost_batch_norm_ref(x, gamma, beta, virtual_batch_size=64)
    assert jnp.max(jnp.abs(out_fb - ref_fb)) < 1e-4, "mismatch vs reference (fallback)"

    # Ragged-chunk path (torch.chunk semantics: sizes 14, 14, 12).
    B2 = 40
    x2 = jax.random.normal(kx, (B2, D), dtype=jnp.float32) - 0.25
    out_rg = ghost_batch_norm(x2, gamma, beta, virtual_batch_size=12, training=True)
    out_rg = jax.block_until_ready(out_rg)
    ref_rg = ghost_batch_norm_ref(x2, gamma, beta, virtual_batch_size=12)
    assert out_rg.shape == (B2, D)
    assert jnp.max(jnp.abs(out_rg - ref_rg)) < 1e-4, "mismatch vs reference (ragged)"

    print("KERNEL_OK")
</pallas_src>

<mosaic_0001>
module attributes {stable_mosaic.version = 11 : i64} {
  func.func @_gbn_kernel(%arg0: i32, %arg1: i32, %arg2: memref<4x8x32xf32, #tpu.memory_space<vmem>>, %arg3: memref<1x1x32xf32, #tpu.memory_space<vmem>>, %arg4: memref<1x1x32xf32, #tpu.memory_space<vmem>>, %arg5: memref<4x8x32xf32, #tpu.memory_space<vmem>>) attributes {dimension_semantics = [#tpu.dimension_semantics<parallel>, #tpu.dimension_semantics<parallel>], iteration_bounds = array<i64: 1, 1>, scalar_prefetch = 0 : i64, scratch_operands = 0 : i64, tpu.core_type = #tpu.core_type<tc>, window_params = [{transform_indices = @transform_0, window_bounds = array<i64: 4, 8, 32>}, {transform_indices = @transform_1, window_bounds = array<i64: 1, 1, 32>}, {transform_indices = @transform_2, window_bounds = array<i64: 1, 1, 32>}, {transform_indices = @transform_3, window_bounds = array<i64: 4, 8, 32>}]} {
    %c0 = arith.constant 0 : index
    %c0_0 = arith.constant 0 : index
    %c0_1 = arith.constant 0 : index
    %0 = vector.load %arg2[%c0, %c0_0, %c0_1] : memref<4x8x32xf32, #tpu.memory_space<vmem>>, vector<4x8x32xf32>
    %cst = arith.constant dense<0.000000e+00> : vector<4x32xf32>
    %1 = vector.multi_reduction <add>, %0, %cst [1] : vector<4x8x32xf32> to vector<4x32xf32>
    %2 = vector.shape_cast %1 : vector<4x32xf32> to vector<4x1x32xf32>
    %cst_2 = arith.constant 8.000000e+00 : f32
    %3 = vector.broadcast %cst_2 : f32 to vector<4x1x32xf32>
    %4 = arith.divf %2, %3 : vector<4x1x32xf32>
    %5 = vector.broadcast %4 : vector<4x1x32xf32> to vector<4x8x32xf32>
    %6 = arith.subf %0, %5 : vector<4x8x32xf32>
    %7 = arith.mulf %6, %6 : vector<4x8x32xf32>
    %cst_3 = arith.constant dense<0.000000e+00> : vector<4x32xf32>
    %8 = vector.multi_reduction <add>, %7, %cst_3 [1] : vector<4x8x32xf32> to vector<4x32xf32>
    %9 = vector.shape_cast %8 : vector<4x32xf32> to vector<4x1x32xf32>
    %cst_4 = arith.constant 8.000000e+00 : f32
    %10 = vector.broadcast %cst_4 : f32 to vector<4x1x32xf32>
    %11 = arith.divf %9, %10 : vector<4x1x32xf32>
    %cst_5 = arith.constant 9.99999974E-6 : f32
    %12 = vector.broadcast %cst_5 : f32 to vector<4x1x32xf32>
    %13 = arith.addf %11, %12 : vector<4x1x32xf32>
    %14 = math.rsqrt %13 : vector<4x1x32xf32>
    %c0_6 = arith.constant 0 : index
    %c0_7 = arith.constant 0 : index
    %c0_8 = arith.constant 0 : index
    %15 = vector.load %arg3[%c0_6, %c0_7, %c0_8] : memref<1x1x32xf32, #tpu.memory_space<vmem>>, vector<1x1x32xf32>
    %16 = vector.broadcast %15 : vector<1x1x32xf32> to vector<4x1x32xf32>
    %17 = arith.mulf %16, %14 : vector<4x1x32xf32>
    %c0_9 = arith.constant 0 : index
    %c0_10 = arith.constant 0 : index
    %c0_11 = arith.constant 0 : index
    %18 = vector.load %arg4[%c0_9, %c0_10, %c0_11] : memref<1x1x32xf32, #tpu.memory_space<vmem>>, vector<1x1x32xf32>
    %19 = arith.mulf %4, %17 : vector<4x1x32xf32>
    %20 = vector.broadcast %18 : vector<1x1x32xf32> to vector<4x1x32xf32>
    %21 = arith.subf %20, %19 : vector<4x1x32xf32>
    %22 = vector.broadcast %17 : vector<4x1x32xf32> to vector<4x8x32xf32>
    %23 = arith.mulf %0, %22 : vector<4x8x32xf32>
    %24 = vector.broadcast %21 : vector<4x1x32xf32> to vector<4x8x32xf32>
    %25 = arith.addf %23, %24 : vector<4x8x32xf32>
    %c0_12 = arith.constant 0 : index
    %c0_13 = arith.constant 0 : index
    %c0_14 = arith.constant 0 : index
    %26 = vector.load %arg5[%c0_12, %c0_13, %c0_14] : memref<4x8x32xf32, #tpu.memory_space<vmem>>, vector<4x8x32xf32>
    tpu.vector_store %arg5[%c0_12, %c0_13, %c0_14], %25 {strides = array<i32>} : memref<4x8x32xf32, #tpu.memory_space<vmem>>, vector<4x8x32xf32>,
    return
  }
  func.func @transform_0(%arg0: i32, %arg1: i32) -> (i32, i32, i32) {
    %c0_i32 = arith.constant 0 : i32
    %c0_i32_0 = arith.constant 0 : i32
    return %arg0, %c0_i32, %arg1 : i32, i32, i32
  }
  func.func @transform_1(%arg0: i32, %arg1: i32) -> (i32, i32, i32) {
    %c0_i32 = arith.constant 0 : i32
    %c0_i32_0 = arith.constant 0 : i32
    %c0_i32_1 = arith.constant 0 : i32
    return %c0_i32, %c0_i32_0, %arg1 : i32, i32, i32
  }
  func.func @transform_2(%arg0: i32, %arg1: i32) -> (i32, i32, i32) {
    %c0_i32 = arith.constant 0 : i32
    %c0_i32_0 = arith.constant 0 : i32
    %c0_i32_1 = arith.constant 0 : i32
    return %c0_i32, %c0_i32_0, %arg1 : i32, i32, i32
  }
  func.func @transform_3(%arg0: i32, %arg1: i32) -> (i32, i32, i32) {
    %c0_i32 = arith.constant 0 : i32
    %c0_i32_0 = arith.constant 0 : i32
    return %arg0, %c0_i32, %arg1 : i32, i32, i32
  }
}

</mosaic_0001>

<bundles_post_ra>
// kernel: tpu_custom_call.1
= control target key start
LH: loop header
LB: loop body
LE: loop exit
PB: predicated region body
PF: predicated region fallthrough
CT: control target
= control target key end

     0   :  { %8 = vsyncpa [#allocation3], 0  ;;  %s374_s0 = inlined_call_operand.hbm [shape: f32[4,8,32], index: 0, kind: input, shape index: {}]   ;;  %s375_s1 = inlined_call_operand.vmem [shape: f32[1,1,32], index: 1, kind: input, shape index: {}]   ;;  %s376_s2 = inlined_call_operand.vmem [shape: f32[1,1,32], index: 2, kind: input, shape index: {}]   ;;  %s377_s3 = inlined_call_operand.hbm [shape: f32[4,8,32], index: 3, kind: output, shape index: {}]  }
   0x1   :  { %9 = vsyncpa [#allocation4], 0  ;;  %s266_s12 = smov [#allocation2]   ;;  %s218_s16 = scalar_lea.hbm %s374_s0, 512 }
   0x2   :  { %s15_s13 = sshll.u32 %s266_s12, 4  ;;  %p219_p0 = scmp.ne.s32.totalorder %s374_s0, %s218_s16  ;;  %s16_s13 = int_to_ptr.vmem [resolvable:$true] %s15_s13 }
   0x3   :  { %p222_p1 = scmp.lt.u32.totalorder %s218_s16, %s374_s0 }
   0x5   :  { %p224_p2 = pnand %p222_p1, %p219_p0 }
   0x7   :  { %227 = shalt.err (!%p224_p2)
}
   0x8   :  { %s228_s21 = scalar_lea.vmem %s16_s13, 512  ;;  %p233_p4 = scmp.lt.s32.totalorder %s16_s13, %s16_s13 }
   0x9   :  { %p229_p3 = scmp.ne.s32.totalorder %s16_s13, %s228_s21  ;;  %p234_p5 = scmp.lt.s32.totalorder %s228_s21, %s228_s21 }
   0xb   :  { %p235_p6 = por %p234_p5, %p233_p4 }
   0xd   :  { %p236_p7 = pnand %p235_p6, %p229_p3 }
   0xf   :  { %239 = shalt.err (!%p236_p7)
}
  0x10   :  { %s267_s22 = smov 128   ;;  %s268_s23 = smov 8  }
  0x11   :  { %21 = dma.hbm_to_vmem [thread:$0]  %s374_s0, 512, %s16_s13, [#allocation3], %s267_s22, %s267_s22, %s268_s23  }
  0x12   :  { %262 = dma.done.wait [#allocation3], 512  }
  0x13   :  { %263 = vsyncadd [#allocation3], 4294966784  ;;  %vm33_vm0 = vcmask 261120   ;;  %v305_v0 = vld [vmem:[#allocation2] sm:$0xff]  ;;  %v309_v2 = vld [vmem:[#allocation2 + $0x8] sm:$0xff] }
  0x14   :  { %v34_v1 = vsel %vm33_vm0, %v305_v0, 0.0  ;;  %v311_v3 = vld [vmem:[#allocation2 + $0x10] sm:$0xff]  ;;  %v313_v4 = vld [vmem:[#allocation2 + $0x18] sm:$0xff]  ;;  %v41_v6 = vsel %vm33_vm0, %v309_v2, 0.0 }
  0x15   :  { %v35_v5 = vrot.slane %v34_v1, 4  ;;  %v48_v7 = vsel %vm33_vm0, %v311_v3, 0.0  ;;  %v55_v8 = vsel %vm33_vm0, %v313_v4, 0.0  ;;  %v42_v9 = vrot.slane %v41_v6, 4 }
  0x16   :  { %v49_v10 = vrot.slane %v48_v7, 4  ;;  %v56_v11 = vrot.slane %v55_v8, 4 }
  0x17   :  { %v36_v12 = vadd.f32 %v35_v5, %v34_v1  ;;  %v43_v13 = vadd.f32 %v42_v9, %v41_v6 }
  0x18   :  { %v50_v14 = vadd.f32 %v49_v10, %v48_v7  ;;  %v57_v15 = vadd.f32 %v56_v11, %v55_v8 }
  0x19   :  { %v37_v16 = vrot.slane %v36_v12, 2  ;;  %v44_v17 = vrot.slane %v43_v13, 2 }
  0x1a   :  { %v51_v18 = vrot.slane %v50_v14, 2  ;;  %v58_v19 = vrot.slane %v57_v15, 2 }
  0x1b   :  { %v38_v20 = vadd.f32 %v37_v16, %v36_v12  ;;  %v45_v21 = vadd.f32 %v44_v17, %v43_v13 }
  0x1c   :  { %v52_v22 = vadd.f32 %v51_v18, %v50_v14  ;;  %v59_v23 = vadd.f32 %v58_v19, %v57_v15 }
  0x1d   :  { %v39_v24 = vrot.slane %v38_v20, 1  ;;  %v46_v25 = vrot.slane %v45_v21, 1 }
  0x1e   :  { %v53_v26 = vrot.slane %v52_v22, 1  ;;  %v60_v27 = vrot.slane %v59_v23, 1 }
  0x1f   :  { %v40_v28 = vadd.f32 %v39_v24, %v38_v20  ;;  %v47_v29 = vadd.f32 %v46_v25, %v45_v21  ;;  %v133_v20 = vlaneseq }
  0x20   :  { %v54_v30 = vadd.f32 %v53_v26, %v52_v22  ;;  %v61_v31 = vadd.f32 %v60_v27, %v59_v23  ;;  %v115_v22 = vld [vmem:[%s375_s1] sm:$0x1]  ;;  %s269_s1 = smov [#allocation5]  }
  0x21   :  { %v321_v32 = vmul.f32 0.125, %v40_v28  ;;  %v323_v33 = vmul.f32 0.125, %v47_v29  ;;  %v134_v21 = vshrl.u32 %v133_v20, 7  ;;  %v120_v28 = vld [vmem:[%s376_s2] sm:$0x1]  ;;  %s194_s2 = sshll.u32 %s269_s1, 4  ;;  %s195_s2 = int_to_ptr.vmem [resolvable:$true] %s194_s2 }
  0x22   :  { %v325_v34 = vmul.f32 0.125, %v54_v30  ;;  %v327_v35 = vmul.f32 0.125, %v61_v31  ;;  %s240_s29 = scalar_lea.vmem %s195_s2, 512  ;;  %p245_p9 = scmp.lt.s32.totalorder %s195_s2, %s195_s2 }
  0x23   :  { %v67_v36 = vsub.f32 %v305_v0, %v321_v32  ;;  %v68_v37 = vsub.f32 %v309_v2, %v323_v33  ;;  %v135_v23 = vsub.s32 0, %v134_v21  ;;  %p241_p8 = scmp.ne.s32.totalorder %s195_s2, %s240_s29  ;;  %p246_p10 = scmp.lt.s32.totalorder %s240_s29, %s240_s29 }
  0x24   :  { %v69_v38 = vsub.f32 %v311_v3, %v325_v34  ;;  %v70_v39 = vsub.f32 %v313_v4, %v327_v35 }
  0x25   :  { %v71_v40 = vmul.f32 %v67_v36, %v67_v36  ;;  %v72_v41 = vmul.f32 %v68_v37, %v68_v37  ;;  %p247_p11 = por %p246_p10, %p245_p9 }
  0x26   :  { %v73_v42 = vmul.f32 %v69_v38, %v69_v38  ;;  %v74_v43 = vmul.f32 %v70_v39, %v70_v39 }
  0x27   :  { %v75_v44 = vsel %vm33_vm0, %v71_v40, 0.0  ;;  %v82_v46 = vsel %vm33_vm0, %v72_v41, 0.0  ;;  %p248_p12 = pnand %p247_p11, %p241_p8 }
  0x28   :  { %v76_v45 = vrot.slane %v75_v44, 4  ;;  %v89_v47 = vsel %vm33_vm0, %v73_v42, 0.0  ;;  %v96_v48 = vsel %vm33_vm0, %v74_v43, 0.0  ;;  %v83_v49 = vrot.slane %v82_v46, 4 }
  0x29   :  { %v90_v50 = vrot.slane %v89_v47, 4  ;;  %v97_v51 = vrot.slane %v96_v48, 4 }
  0x2a   :  { %v77_v52 = vadd.f32 %v76_v45, %v75_v44  ;;  %v84_v53 = vadd.f32 %v83_v49, %v82_v46 }
  0x2b   :  { %v91_v54 = vadd.f32 %v90_v50, %v89_v47  ;;  %v98_v55 = vadd.f32 %v97_v51, %v96_v48 }
  0x2c   :  { %v78_v56 = vrot.slane %v77_v52, 2  ;;  %v85_v57 = vrot.slane %v84_v53, 2 }
  0x2d   :  { %v92_v58 = vrot.slane %v91_v54, 2  ;;  %v99_v59 = vrot.slane %v98_v55, 2 }
  0x2e   :  { %v79_v60 = vadd.f32 %v78_v56, %v77_v52  ;;  %v86_v61 = vadd.f32 %v85_v57, %v84_v53 }
  0x2f   :  { %v93_v62 = vadd.f32 %v92_v58, %v91_v54  ;;  %v100_v63 = vadd.f32 %v99_v59, %v98_v55 }
  0x30   :  { %v80_v1 = vrot.slane %v79_v60, 1  ;;  %v87_v5 = vrot.slane %v86_v61, 1 }
  0x31   :  { %v94_v6 = vrot.slane %v93_v62, 1  ;;  %v101_v7 = vrot.slane %v100_v63, 1 }
  0x32   :  { %v81_v8 = vadd.f32 %v80_v1, %v79_v60  ;;  %v88_v9 = vadd.f32 %v87_v5, %v86_v61 }
  0x33   :  { %v95_v10 = vadd.f32 %v94_v6, %v93_v62  ;;  %v102_v11 = vadd.f32 %v101_v7, %v100_v63 }
  0x34   :  { %v103_v12 = vmul.f32 0.125, %v81_v8  ;;  %v104_v13 = vmul.f32 0.125, %v88_v9 }
  0x35   :  { %v105_v14 = vmul.f32 0.125, %v95_v10  ;;  %v106_v15 = vmul.f32 0.125, %v102_v11 }
  0x36   :  { %v107_v16 = vadd.f32 1e-05, %v103_v12  ;;  %v108_v17 = vadd.f32 1e-05, %v104_v13 }
  0x37   :  { %v109_v18 = vadd.f32 1e-05, %v105_v14  ;;  %v110_v19 = vadd.f32 1e-05, %v106_v15 }
  0x38   :  { %210 = vrsqrt.f32 %v107_v16 }
  0x39   :  { %212 = vrsqrt.f32 %v108_v17 }
  0x3a   :  { %214 = vrsqrt.f32 %v109_v18 }
  0x3b   :  { %216 = vrsqrt.f32 %v110_v19 }
  0x42   :  { %v211_v24 = vpop.eup %210 }
  0x43   :  { %v213_v25 = vpop.eup %212  ;;  %v116_v26 = vmul.f32 %v211_v24, %v115_v22 }
  0x44   :  { %v215_v27 = vpop.eup %214  ;;  %v117_v29 = vmul.f32 %v213_v25, %v115_v22 }
  0x45   :  { %v217_v30 = vpop.eup %216  ;;  %v121_v31 = vmul.f32 %v116_v26, %v321_v32  ;;  %v136_v36 = vrot.slane %v116_v26, %v135_v23  ;;  %v118_v37 = vmul.f32 %v215_v27, %v115_v22 }
  0x46   :  { %v122_v38 = vmul.f32 %v117_v29, %v323_v33  ;;  %v140_v39 = vrot.slane %v117_v29, %v135_v23  ;;  %v119_v40 = vmul.f32 %v217_v30, %v115_v22 }
  0x47   :  { %v125_v41 = vsub.f32 %v120_v28, %v121_v31  ;;  %v153_v42 = vmul.f32 %v136_v36, %v305_v0  ;;  %v123_v43 = vmul.f32 %v118_v37, %v325_v34  ;;  %v144_v44 = vrot.slane %v118_v37, %v135_v23 }
  0x48   :  { %v126_v45 = vsub.f32 %v120_v28, %v122_v38  ;;  %v154_v46 = vmul.f32 %v140_v39, %v309_v2  ;;  %v124_v47 = vmul.f32 %v119_v40, %v327_v35  ;;  %v148_v48 = vrot.slane %v119_v40, %v135_v23 }
  0x49   :  { %v164_v49 = vrot.slane %v125_v41, %v135_v23  ;;  %v127_v32 = vsub.f32 %v120_v28, %v123_v43  ;;  %v155_v50 = vmul.f32 %v144_v44, %v311_v3 }
  0x4a   :  { %v168_v51 = vrot.slane %v126_v45, %v135_v23  ;;  %v128_v33 = vsub.f32 %v120_v28, %v124_v47  ;;  %v156_v52 = vmul.f32 %v148_v48, %v313_v4 }
  0x4b   :  { %v181_v53 = vadd.f32 %v164_v49, %v153_v42  ;;  %v172_v54 = vrot.slane %v127_v32, %v135_v23 }
  0x4c   :  { %v182_v0 = vadd.f32 %v168_v51, %v154_v46  ;;  %v176_v34 = vrot.slane %v128_v33, %v135_v23 }
  0x4d   :  { %185 = vst.msk [vmem:[#allocation5] sm:$0xff] %vm33_vm0, %v181_v53  ;;  %v183_v2 = vadd.f32 %v172_v54, %v155_v50 }
  0x4e   :  { %186 = vst.msk [vmem:[#allocation5 + $0x8] sm:$0xff] %vm33_vm0, %v182_v0  ;;  %v184_v35 = vadd.f32 %v176_v34, %v156_v52 }
  0x4f   :  { %187 = vst.msk [vmem:[#allocation5 + $0x10] sm:$0xff] %vm33_vm0, %v183_v2 }
  0x50   :  { %188 = vst.msk [vmem:[#allocation5 + $0x18] sm:$0xff] %vm33_vm0, %v184_v35 }
  0x51   :  { %251 = shalt.err (!%p248_p12)
}
  0x52   :  { %s252_s5 = scalar_lea.hbm %s377_s3, 512 }
  0x53   :  { %p253_p13 = scmp.ne.s32.totalorder %s377_s3, %s252_s5  ;;  %p256_p0 = scmp.lt.u32.totalorder %s252_s5, %s377_s3 }
  0x55   :  { %p258_p1 = pnand %p256_p0, %p253_p13 }
  0x57   :  { %261 = shalt.err (!%p258_p1)
}
  0x58   :  { %200 = dma.vmem_to_hbm [thread:$0]  %s195_s2, 512, %s377_s3, [#allocation4], %s267_s22, %s267_s22, %s268_s23  }
  0x59   :  { %264 = dma.done.wait [#allocation4], 512  }
  0x5a   :  { %265 = vsyncadd [#allocation4], 4294966784 }
  0x5b   :  { %204 = vsyncpa [#allocation3], 1 }
  0x5c   :  { %205 = vsyncpa [#allocation4], 1 }

</bundles_post_ra>
